<compile_context>
chip_gen: v7x
topology: tpu7x:2x2x1
jax: 0.10.0
libtpu: 0.0.40
codegen_flags: <defaults>
</compile_context>

<pallas_src>
import functools

import jax
import jax.numpy as jnp
from jax import lax
from jax.experimental import pallas as pl
from jax.experimental.pallas import tpu as pltpu

_EPS = 1e-5
_TM_MAX = 512                 # M-tile upper bound
_VMEM_WS_BUDGET = 24 << 20    # target double-buffered working set (v7x-safe)
_VMEM_LIMIT_CAP = 48 << 20    # stay well under v7x's 64 MiB per-TC VMEM


def _ceil_to(x, m):
    return ((x + m - 1) // m) * m


# ----------------------------- Pallas kernel -----------------------------

def _fused_gemm_kernel(*refs, dual, relu):
    """acc = x1@w1 [+ x2@w2] (f32 accumulation);  y = opt_relu(acc + bias).

    The BatchNorm scale is pre-folded into the weight columns offline, so the
    epilogue is only a bias add (+ optional ReLU)."""
    if dual:
        x1_ref, w1_ref, x2_ref, w2_ref, b_ref, o_ref = refs
    else:
        x1_ref, w1_ref, b_ref, o_ref = refs
    acc = jnp.dot(x1_ref[...], w1_ref[...], preferred_element_type=jnp.float32)
    if dual:
        acc = acc + jnp.dot(x2_ref[...], w2_ref[...],
                            preferred_element_type=jnp.float32)
    y = acc + b_ref[...]
    if relu:
        y = jnp.maximum(y, 0.0)
    o_ref[...] = y.astype(o_ref.dtype)


@functools.partial(jax.jit, static_argnames=("relu", "out_dtype"))
def fused_gemm(x1, w1, bias, relu=False, x2=None, w2=None,
               out_dtype=jnp.float32):
    """y = opt_relu((x1 @ w1 [+ x2 @ w2]) + bias).

    x*:[M,K*] bf16, w*:[K*,Np] bf16 (BN scale pre-folded, N padded to a lane
    multiple), bias:[1,Np] f32.  Returns [M, Np]; caller slices N."""
    dual = x2 is not None
    M, K1 = x1.shape
    Np = w1.shape[1]
    K2 = x2.shape[1] if dual else 0
    Ktot = K1 + K2
    out_isz = jnp.dtype(out_dtype).itemsize

    # N tiling: keep the whole weight resident in VMEM when it fits (the
    # weight block index then never changes -> DMA'd from HBM exactly once).
    if Np <= 512:
        TN = Np
    elif Np % 256 == 0:
        TN = 256            # feed the 256-wide MXU on v6e/v7x
    else:
        TN = 128

    # M tiling: aim for >=2 tiles (both v7x TensorCores get work), bound the
    # double-buffered working set for v7x's 64 MiB VMEM, ragged tail handled
    # by pl.cdiv (no hot-path padding of the patch tensor).
    def ws_bytes(tm):
        return (2 * (tm * Ktot + Ktot * TN) * 2      # dbl-buffered bf16 x / w
                + 2 * tm * TN * out_isz              # dbl-buffered output
                + 4 * TN * 4)                        # bias
    if M <= 8:
        TM = M
    else:
        TM = min(_TM_MAX, _ceil_to((M + 1) // 2, 8))
        while TM > 64 and ws_bytes(TM) > _VMEM_WS_BUDGET:
            TM -= 64

    grid = (pl.cdiv(M, TM), pl.cdiv(Np, TN))

    operands = [x1, w1]
    in_specs = [pl.BlockSpec((TM, K1), lambda i, j: (i, 0)),
                pl.BlockSpec((K1, TN), lambda i, j: (0, j))]
    if dual:
        operands += [x2, w2]
        in_specs += [pl.BlockSpec((TM, K2), lambda i, j: (i, 0)),
                     pl.BlockSpec((K2, TN), lambda i, j: (0, j))]
    operands.append(bias)
    in_specs.append(pl.BlockSpec((1, TN), lambda i, j: (0, j)))

    flops = 2 * M * Ktot * Np
    bytes_accessed = int(sum(int(o.size) * o.dtype.itemsize for o in operands)
                         + M * Np * out_isz)
    vmem_limit = int(min(max(int(1.5 * ws_bytes(TM)) + (4 << 20), 16 << 20),
                         _VMEM_LIMIT_CAP))

    return pl.pallas_call(
        functools.partial(_fused_gemm_kernel, dual=dual, relu=relu),
        out_shape=jax.ShapeDtypeStruct((M, Np), out_dtype),
        grid=grid,
        in_specs=in_specs,
        out_specs=pl.BlockSpec((TM, TN), lambda i, j: (i, j)),
        compiler_params=pltpu.CompilerParams(
            dimension_semantics=("parallel", "parallel"),
            vmem_limit_bytes=vmem_limit),
        cost_estimate=pl.CostEstimate(flops=flops, transcendentals=0,
                                      bytes_accessed=bytes_accessed),
    )(*operands)


# ----------------------------- JAX glue -----------------------------

def _im2col(xn, kh, kw, stride, padding):
    """NHWC im2col -> [B*Ho*Wo, kh*kw*C] (tap-major, channel-minor)."""
    B, H, W, C = xn.shape
    Ho = (H + 2 * padding - kh) // stride + 1
    Wo = (W + 2 * padding - kw) // stride + 1
    if kh == 1 and kw == 1 and stride == 1 and padding == 0:
        return xn.reshape(B * H * W, C), Ho, Wo
    if padding:
        xn = jnp.pad(xn, ((0, 0), (padding, padding), (padding, padding), (0, 0)))
    cols = []
    for i in range(kh):
        for j in range(kw):
            cols.append(xn[:, i:i + (Ho - 1) * stride + 1:stride,
                           j:j + (Wo - 1) * stride + 1:stride, :])
    return jnp.concatenate(cols, -1).reshape(B * Ho * Wo, kh * kw * C), Ho, Wo


def avgpool2x2(x):
    s = lax.reduce_window(x, 0.0, lax.add, (1, 2, 2, 1), (1, 2, 2, 1), "VALID")
    return s * 0.25


# ----------------------------- FFC sub-modules -----------------------------

def fourier_unit(x, p):
    """x: NHWC.  rfft -> (1x1 conv + BN + ReLU as one fused GEMM) -> irfft."""
    B, H, W, C = x.shape
    f = jnp.fft.rfftn(x.astype(jnp.float32), s=(H, W), axes=(1, 2), norm="ortho")
    fr = jnp.concatenate([jnp.real(f), jnp.imag(f)], axis=-1)      # [B,H,Wf,2C]
    Wf = fr.shape[2]
    M = B * H * Wf
    cout = p["cout"]
    # NOTE: bf16 GEMM input trades a little spectral precision for MXU speed.
    y = fused_gemm(fr.reshape(M, 2 * C).astype(jnp.bfloat16),
                   p["w"], p["b"], relu=True)
    y = y[:, :2 * cout].reshape(B, H, Wf, 2 * cout)
    yr, yi = jnp.split(y, 2, axis=-1)
    return jnp.fft.irfftn(yr + 1j * yi, s=(H, W), axes=(1, 2), norm="ortho")


def spectral_transform(xg, p, stride, enable_lfu):
    """Returns (x + fu(x) + lfu(x)) in bf16; conv2 is fused by the caller."""
    if stride == 2:
        xg = avgpool2x2(xg)
    B, H, W, Cin = xg.shape
    cmid = p["cmid"]
    M = B * H * W
    y = fused_gemm(xg.reshape(M, Cin).astype(jnp.bfloat16),
                   p["conv1_w"], p["conv1_b"], relu=True,
                   out_dtype=jnp.bfloat16)                 # bf16 intermediate
    x = y[:, :cmid].reshape(B, H, W, cmid)
    out = fourier_unit(x, p["fu"])
    if enable_lfu:
        assert H % 2 == 0 and W % 2 == 0 and cmid % 4 == 0, \
            "LFU path needs even H, W and cmid divisible by 4"
        xs = x[..., :cmid // 4]
        xs = jnp.concatenate(jnp.split(xs, 2, axis=1), axis=-1)   # split H
        xs = jnp.concatenate(jnp.split(xs, 2, axis=2), axis=-1)   # split W
        xs = fourier_unit(xs, p["lfu"])
        xs = jnp.tile(xs, (1, 2, 2, 1))
    else:
        xs = 0.0
    return (x.astype(jnp.float32) + out + xs).astype(jnp.bfloat16)


def ffc_bn_act_forward(params, x_l, x_g):
    """NHWC inputs (x_l, x_g); NHWC outputs (out_l, out_g)."""
    cfg = params["cfg"]
    k, stride, pad = cfg["kernel_size"], cfg["stride"], cfg["padding"]
    relu = cfg["act_relu"]
    in_cl, in_cg = cfg["in_cl"], cfg["in_cg"]
    out_cl, out_cg = cfg["out_cl"], cfg["out_cg"]

    # Channel-blocked im2col: local/global patches stay separate operands so
    # the l2g GEMM never multiplies zero-padded global K rows.
    patches_l = patches_g = None
    if in_cl > 0:
        patches_l, Ho, Wo = _im2col(x_l.astype(jnp.bfloat16), k, k, stride, pad)
    if in_cg > 0:
        patches_g, Ho, Wo = _im2col(x_g.astype(jnp.bfloat16), k, k, stride, pad)
    B = (x_l if x_l is not None else x_g).shape[0]
    M = B * Ho * Wo

    out_l = out_g = None
    if out_cl > 0:
        # relu(bn_l(convl2l(x_l) + convg2l(x_g)))  ==  one dual GEMM
        if in_cl > 0 and in_cg > 0:
            y = fused_gemm(patches_l, params["w_l2l"], params["b_l"],
                           relu=relu, x2=patches_g, w2=params["w_g2l"])
        elif in_cl > 0:
            y = fused_gemm(patches_l, params["w_l2l"], params["b_l"], relu=relu)
        else:
            y = fused_gemm(patches_g, params["w_g2l"], params["b_l"], relu=relu)
        out_l = y[:, :out_cl].reshape(B, Ho, Wo, out_cl)

    if out_cg > 0:
        spec = None
        if in_cg > 0:
            spec = spectral_transform(x_g, params["g2g"], stride,
                                      cfg["enable_lfu"]).reshape(M, -1)
        if in_cl > 0 and in_cg > 0:
            # relu(bn_g(convl2g(x_l) + conv2(spectral)))  ==  one dual GEMM
            y = fused_gemm(patches_l, params["w_l2g"], params["b_g"],
                           relu=relu, x2=spec, w2=params["g2g"]["conv2_w"])
        elif in_cl > 0:
            y = fused_gemm(patches_l, params["w_l2g"], params["b_g"], relu=relu)
        else:
            y = fused_gemm(spec, params["g2g"]["conv2_w"], params["b_g"],
                           relu=relu)
        out_g = y[:, :out_cg].reshape(B, Ho, Wo, out_cg)
    return out_l, out_g


def ffc_bn_act_apply(params, x_nchw):
    """NCHW input (split into local/global channel groups), NCHW outputs."""
    cfg = params["cfg"]
    x = jnp.transpose(x_nchw, (0, 2, 3, 1))        # single layout change in
    in_cl = cfg["in_cl"]
    x_l = x[..., :in_cl] if in_cl > 0 else None
    x_g = x[..., in_cl:] if cfg["in_cg"] > 0 else None
    y_l, y_g = ffc_bn_act_forward(params, x_l, x_g)
    nchw = lambda t: None if t is None else jnp.transpose(t, (0, 3, 1, 2))
    return nchw(y_l), nchw(y_g)                    # single layout change out


# ----------------------------- parameter construction -----------------------------
# Everything layout/precision related is hoisted here: weights are transposed
# to [K, N], BN scale folded into the columns, N padded to a lane multiple and
# cast to bf16 exactly once.

def _bn_affine(c):
    # Inference-mode BatchNorm2d, fresh stats (gamma=1, beta=0, mean=0, var=1).
    gamma = jnp.ones((c,), jnp.float32)
    beta = jnp.zeros((c,), jnp.float32)
    mean = jnp.zeros((c,), jnp.float32)
    var = jnp.ones((c,), jnp.float32)
    s = gamma / jnp.sqrt(var + _EPS)
    return s, beta - mean * s


def _bias_padded(b, Np):
    return jnp.zeros((1, Np), jnp.float32).at[0, :b.shape[0]].set(b)


def _conv_kn(w_oihw, Np, scale=None):
    """OIHW conv weight -> [kh*kw*Cin, Np] bf16 (tap-major, channel-minor),
    with the BN scale folded into the output columns."""
    O, I, kh, kw = w_oihw.shape
    kn = jnp.transpose(w_oihw, (2, 3, 1, 0)).reshape(kh * kw * I, O)
    if scale is not None:
        kn = kn * scale[None, :]
    return jnp.pad(kn, ((0, 0), (0, Np - O))).astype(jnp.bfloat16)


def make_ffc_bn_act(key, in_channels, out_channels, kernel_size, ratio_gin,
                    ratio_gout, stride=1, padding=0, enable_lfu=True,
                    act_relu=True):
    in_cg = int(in_channels * ratio_gin)
    in_cl = in_channels - in_cg
    out_cg = int(out_channels * ratio_gout)
    out_cl = out_channels - out_cg
    k = kernel_size
    keys = iter(jax.random.split(key, 16))

    def w(out_c, in_c, kk):
        fan = max(in_c * kk * kk, 1)
        return jax.random.normal(next(keys), (out_c, in_c, kk, kk),
                                 jnp.float32) * (fan ** -0.5)

    params = {"cfg": dict(kernel_size=k, stride=stride, padding=padding,
                          in_cl=in_cl, in_cg=in_cg, out_cl=out_cl,
                          out_cg=out_cg, enable_lfu=enable_lfu,
                          act_relu=act_relu)}

    if out_cl > 0:
        Npl = _ceil_to(out_cl, 128)
        s, b = _bn_affine(out_cl)
        params["b_l"] = _bias_padded(b, Npl)
        if in_cl > 0:
            params["w_l2l"] = _conv_kn(w(out_cl, in_cl, k), Npl, s)  # convl2l
        if in_cg > 0:
            params["w_g2l"] = _conv_kn(w(out_cl, in_cg, k), Npl, s)  # convg2l

    if out_cg > 0:
        Npg = _ceil_to(out_cg, 128)
        s, b = _bn_affine(out_cg)
        params["b_g"] = _bias_padded(b, Npg)
        if in_cl > 0:
            params["w_l2g"] = _conv_kn(w(out_cg, in_cl, k), Npg, s)  # convl2g
        if in_cg > 0:                           # convg2g = SpectralTransform
            cmid = out_cg // 2
            Npm = _ceil_to(cmid, 128)
            s1, b1 = _bn_affine(cmid)
            g2g = {"cmid": cmid,
                   "conv1_w": _conv_kn(w(cmid, in_cg, 1), Npm, s1),
                   "conv1_b": _bias_padded(b1, Npm)}

            def make_fu():
                Nf = _ceil_to(2 * cmid, 128)
                fs, fb = _bn_affine(2 * cmid)
                return {"w": _conv_kn(w(2 * cmid, 2 * cmid, 1), Nf, fs),
                        "b": _bias_padded(fb, Nf), "cout": cmid}

            g2g["fu"] = make_fu()
            g2g["lfu"] = make_fu() if enable_lfu else None
            # conv2 has no BN of its own; bn_g applies to (l2g + conv2)
            # jointly, so its scale is folded into conv2's columns as well.
            g2g["conv2_w"] = _conv_kn(w(out_cg, cmid, 1), Npg, s)
            params["g2g"] = g2g
    return params


# ----------------------------- demo -----------------------------

if __name__ == "__main__":
    B, C_in, H, W = 2, 16, 16, 16
    C_out, k, ratio = 32, 3, 0.5

    params = make_ffc_bn_act(jax.random.PRNGKey(0), C_in, C_out, kernel_size=k,
                             ratio_gin=ratio, ratio_gout=ratio, stride=1,
                             padding=1, enable_lfu=True, act_relu=True)
    x = jax.random.normal(jax.random.PRNGKey(0), (B, C_in, H, W), jnp.float32)

    fwd = jax.jit(lambda xx: ffc_bn_act_apply(params, xx))
    out_l, out_g = fwd(x)
    out_l = jax.block_until_ready(out_l)
    out_g = jax.block_until_ready(out_g)

    assert out_l.shape == (B, C_out - int(C_out * ratio), H, W), out_l.shape
    assert out_g.shape == (B, int(C_out * ratio), H, W), out_g.shape
    assert bool(jnp.all(jnp.isfinite(out_l))) and bool(jnp.all(jnp.isfinite(out_g)))
    print("KERNEL_OK")
</pallas_src>

<mosaic_0001>
module attributes {stable_mosaic.version = 11 : i64} {
  func.func @_fused_gemm_kernel(%arg0: i32, %arg1: i32, %arg2: memref<256x72xbf16, #tpu.memory_space<vmem>>, %arg3: memref<72x128xbf16, #tpu.memory_space<vmem>>, %arg4: memref<256x72xbf16, #tpu.memory_space<vmem>>, %arg5: memref<72x128xbf16, #tpu.memory_space<vmem>>, %arg6: memref<1x128xf32, #tpu.memory_space<vmem>>, %arg7: memref<256x128xf32, #tpu.memory_space<vmem>>) attributes {dimension_semantics = [#tpu.dimension_semantics<parallel>, #tpu.dimension_semantics<parallel>], iteration_bounds = array<i64: 2, 1>, scalar_prefetch = 0 : i64, scratch_operands = 0 : i64, tpu.core_type = #tpu.core_type<tc>, window_params = [{transform_indices = @transform_0, window_bounds = array<i64: 256, 72>}, {transform_indices = @transform_1, window_bounds = array<i64: 72, 128>}, {transform_indices = @transform_2, window_bounds = array<i64: 256, 72>}, {transform_indices = @transform_3, window_bounds = array<i64: 72, 128>}, {transform_indices = @transform_4, window_bounds = array<i64: 1, 128>}, {transform_indices = @transform_5, window_bounds = array<i64: 256, 128>}]} {
    %c0 = arith.constant 0 : index
    %c0_0 = arith.constant 0 : index
    %0 = vector.load %arg2[%c0, %c0_0] : memref<256x72xbf16, #tpu.memory_space<vmem>>, vector<256x72xbf16>
    %c0_1 = arith.constant 0 : index
    %c0_2 = arith.constant 0 : index
    %1 = vector.load %arg3[%c0_1, %c0_2] : memref<72x128xbf16, #tpu.memory_space<vmem>>, vector<72x128xbf16>
    %cst = arith.constant dense<0.000000e+00> : vector<256x128xf32>
    %2 = tpu.matmul %0, %1, %cst {dimension_numbers = #tpu.dot_dimension_numbers<[1], [0], [0], [1], [0, 0, 1, 1], [], []>} : vector<256x72xbf16>, vector<72x128xbf16>, vector<256x128xf32> -> vector<256x128xf32>
    %c0_3 = arith.constant 0 : index
    %c0_4 = arith.constant 0 : index
    %3 = vector.load %arg4[%c0_3, %c0_4] : memref<256x72xbf16, #tpu.memory_space<vmem>>, vector<256x72xbf16>
    %c0_5 = arith.constant 0 : index
    %c0_6 = arith.constant 0 : index
    %4 = vector.load %arg5[%c0_5, %c0_6] : memref<72x128xbf16, #tpu.memory_space<vmem>>, vector<72x128xbf16>
    %cst_7 = arith.constant dense<0.000000e+00> : vector<256x128xf32>
    %5 = tpu.matmul %3, %4, %cst_7 {dimension_numbers = #tpu.dot_dimension_numbers<[1], [0], [0], [1], [0, 0, 1, 1], [], []>} : vector<256x72xbf16>, vector<72x128xbf16>, vector<256x128xf32> -> vector<256x128xf32>
    %6 = arith.addf %2, %5 : vector<256x128xf32>
    %c0_8 = arith.constant 0 : index
    %c0_9 = arith.constant 0 : index
    %7 = vector.load %arg6[%c0_8, %c0_9] : memref<1x128xf32, #tpu.memory_space<vmem>>, vector<1x128xf32>
    %8 = vector.broadcast %7 : vector<1x128xf32> to vector<256x128xf32>
    %9 = arith.addf %6, %8 : vector<256x128xf32>
    %cst_10 = arith.constant 0.000000e+00 : f32
    %10 = vector.broadcast %cst_10 : f32 to vector<256x128xf32>
    %11 = arith.maximumf %9, %10 : vector<256x128xf32>
    %c0_11 = arith.constant 0 : index
    %c0_12 = arith.constant 0 : index
    %12 = vector.load %arg7[%c0_11, %c0_12] : memref<256x128xf32, #tpu.memory_space<vmem>>, vector<256x128xf32>
    tpu.vector_store %arg7[%c0_11, %c0_12], %11 {strides = array<i32>} : memref<256x128xf32, #tpu.memory_space<vmem>>, vector<256x128xf32>,
    return
  }
  func.func @transform_0(%arg0: i32, %arg1: i32) -> (i32, i32) {
    %c0_i32 = arith.constant 0 : i32
    %c0_i32_0 = arith.constant 0 : i32
    return %arg0, %c0_i32 : i32, i32
  }
  func.func @transform_1(%arg0: i32, %arg1: i32) -> (i32, i32) {
    %c0_i32 = arith.constant 0 : i32
    %c0_i32_0 = arith.constant 0 : i32
    return %c0_i32, %arg1 : i32, i32
  }
  func.func @transform_2(%arg0: i32, %arg1: i32) -> (i32, i32) {
    %c0_i32 = arith.constant 0 : i32
    %c0_i32_0 = arith.constant 0 : i32
    return %arg0, %c0_i32 : i32, i32
  }
  func.func @transform_3(%arg0: i32, %arg1: i32) -> (i32, i32) {
    %c0_i32 = arith.constant 0 : i32
    %c0_i32_0 = arith.constant 0 : i32
    return %c0_i32, %arg1 : i32, i32
  }
  func.func @transform_4(%arg0: i32, %arg1: i32) -> (i32, i32) {
    %c0_i32 = arith.constant 0 : i32
    %c0_i32_0 = arith.constant 0 : i32
    return %c0_i32, %arg1 : i32, i32
  }
  func.func @transform_5(%arg0: i32, %arg1: i32) -> (i32, i32) {
    %c0_i32 = arith.constant 0 : i32
    return %arg0, %arg1 : i32, i32
  }
}

</mosaic_0001>

<bundles_post_ra>
// kernel: fused_gemm.1
= control target key start
LH: loop header
LB: loop body
LE: loop exit
PB: predicated region body
PF: predicated region fallthrough
CT: control target
= control target key end

     0   :  { %10 = vsyncpa [#allocation3], 0  ;;  %s2034_s0 = inlined_call_operand.vmem [shape: bf16[512,72], index: 0, kind: input, shape index: {}]   ;;  %s2035_s1 = inlined_call_operand.vmem [shape: bf16[72,128], index: 1, kind: input, shape index: {}]   ;;  %s2036_s2 = inlined_call_operand.vmem [shape: bf16[512,72], index: 2, kind: input, shape index: {}]   ;;  %s2037_s3 = inlined_call_operand.vmem [shape: bf16[72,128], index: 3, kind: input, shape index: {}]   ;;  %s2038_s4 = inlined_call_operand.vmem [shape: f32[1,128], index: 4, kind: input, shape index: {}]   ;;  %s2039_s5 = inlined_call_operand.hbm [shape: f32[512,128], index: 5, kind: output, shape index: {}]  }
   0x1   :  { %12 = vsyncpa [#allocation3 + $0x1], 0  ;;  %s1743_s18 = smov 0   ;;  %s1745_s19 = smov 0  }
   0x2   :  { %s1747_s20 = smov 0   ;;  %s1749_s21 = smov 0  }
   0x3   :  { %s1751_s22 = smov 0   ;;  %s1753_s23 = smov 0  }
   0x4 LB: > { %s1277_s24 = sadd.s32 4294967295, %s1708_s23   ;;  %s1278_s25 = sadd.s32 4294967294, %s1708_s23   ;;  %s1708_s23 = sphi %s1753_s23, %s18_s23   ;;  %s1704_s22 = sphi %s1751_s22, %s2046_s22   ;;  %s1700_s21 = sphi %s1749_s21, %s2045_s21   ;;  %s1696_s20 = sphi %s1747_s20, %s2044_s20   ;;  %s1692_s19 = sphi %s1745_s19, %s2043_s19   ;;  %s1688_s18 = sphi %s1743_s18, %s2042_s18  }
   0x5   : > { %s30_s26 = sadd.s32 1, %s1704_s22  ;;  %s169_s27 = sadd.s32 1, %s1696_s20 }
   0x6   : > { %p32_p0 = scmp.ge.s32.totalorder %s30_s26, 2  ;;  %p179_p1 = scmp.ne.s32.totalorder %s1696_s20, %s1692_s19 }
   0x7   : > { %p180_p2 = scmp.eq.s32.totalorder %s1277_s24, 1  ;;  %p185_p3 = scmp.ne.s32.totalorder %s1692_s19, %s1688_s18 }
   0x8   : > { %s2048_s26 = smov (%p32_p0, %s30_s26), 0  ;;  %p186_p5 = scmp.eq.s32.totalorder %s1278_s25, 1 }
   0x9   : > { %p1783_p4 = por %p180_p2, %p179_p1  ;;  %s164_s29 = ssub.s32 %s1704_s22, %s2048_s26 }
   0xa   : > { %p1284_p6 = scmp.ge.s32.totalorder %s1708_s23, 1  ;;  %p167_p7 = scmp.eq.s32.totalorder %s164_s29, 0 }
   0xb   : > { %p1790_p8 = por %p186_p5, %p185_p3  ;;  %p242_p9 = scmp.lt.s32.totalorder %s1708_s23, 3 }
   0xc   : > { %s1796_s6 = scalar_select %p167_p7, %s1696_s20, %s169_s27  }
   0xd   : > { %p243_p10 = pnand %p1284_p6, %p242_p9 }
   0xe   : > { %v1588_v0 = vld [vmem:[%s2037_s3] sm:$0xff] (!%p243_p10)   ;;  %s1286_s11 = sshll.u32 (!%p243_p10), %s1700_s21, 5  ;;  %v1590_v2 = vld [vmem:[%s2037_s3 + $0x8] sm:$0xff] (!%p243_p10)   ;;  %v1592_v4 = vld [vmem:[%s2037_s3 + $0x10] sm:$0xff] (!%p243_p10)   ;;  %vm500_vm0 = vcmask (!%p243_p10), 588800   ;;  %vm549_vm1 = vcmask (!%p243_p10), 1043456  }
   0xf   : > { %246 = sbr.rel (%p243_p10) target bundleno = 328 (0x148), region = 40  ;;  %v1589_v1 = vld [vmem:[%s2035_s1] sm:$0xff] (!%p243_p10)   ;;  %1413 = vmatprep.subr.bf16.mxu1 (!%p243_p10), %v1588_v0  ;;  %p287_p11 = scmp.lt.s32.totalorder (!%p243_p10), %s1286_s11, 63  ;;  %v1591_v3 = vld [vmem:[%s2035_s1 + $0x8] sm:$0xff] (!%p243_p10)   ;;  %v1593_v5 = vld [vmem:[%s2035_s1 + $0x10] sm:$0xff] (!%p243_p10)  }
  0x10   : > { %1455 = vmatprep.subr.bf16.mxu0 (!%p243_p10), %v1589_v1  ;;  %1414 = vmatpush3.bf16.msra.mxu1 (!%p243_p10), %v1588_v0  ;;  %v1594_v6 = vld [vmem:[%s2037_s3 + $0x18] sm:$0xff] (!%p243_p10)   ;;  %v1596_v10 = vld [vmem:[%s2037_s3 + $0x20] ss:$0 sps:$4 sm:$0xff] (!%p243_p10)   ;;  %s1370_s10 = sshll.u32 (!%p243_p10), %s1700_s21, 12  ;;  %s1710_s16 = smov (!%p243_p10), [#allocation2]  }
  0x11   : > { %1456 = vmatpush3.bf16.msra.mxu0 (!%p243_p10), %v1589_v1  ;;  %1415 = vmatprep.subr.bf16.mxu1 (!%p243_p10), %v1590_v2  ;;  %v1595_v7 = vld [vmem:[%s2035_s1 + $0x18] sm:$0xff] (!%p243_p10)   ;;  %v1597_v11 = vld [vmem:[%s2035_s1 + $0x20] ss:$0 sps:$4 sm:$0xff] (!%p243_p10)   ;;  %v551_v12 = vsel (!%p243_p10), %vm549_vm1, %v1596_v10, 0  ;;  %s1634_s17 = sshll.u32 (!%p243_p10), %s1710_s16, 4  ;;  %s1635_s17 = int_to_ptr.vmem [resolvable:$false] %s1634_s17 }
  0x12   : > { %1457 = vmatprep.subr.bf16.mxu0 (!%p243_p10), %v1591_v3  ;;  %v870_v13 = vsel (!%p243_p10), %vm549_vm1, %v1597_v11, 0  ;;  %v1907_v46 = vld [vmem:[%s2038_s4] ss:$0 sm:$0xff] (!%p243_p10)  ;;  %s1636_s24 = scalar_lea.vmem (!%p243_p10), %s1635_s17, 8192 }
  0x14   : > { %1416 = vmatpush3.bf16.msra.mxu1 (!%p243_p10), %v1590_v2 }
  0x15   : > { %1458 = vmatpush3.bf16.msra.mxu0 (!%p243_p10), %v1591_v3  ;;  %1417 = vmatprep.subr.bf16.mxu1 (!%p243_p10), %v1592_v4 }
  0x16   : > { %s2050_s11 = smov (!%p287_p11, %s1286_s11), 63  ;;  %1459 = vmatprep.subr.bf16.mxu0 %v1593_v5 }
  0x17   : > { %s1287_s27 = sshll.u32 %s2050_s11, 2  ;;  %s1979_s11 = scalar_lea.hbm %s2039_s5, %s1370_s10 }
  0x18   : > { %s1820_s8 = scalar_lea.vmem %s2036_s2, %s1287_s27  ;;  %s1828_s14 = scalar_lea.vmem %s2034_s0, %s1287_s27  ;;  %1418 = vmatpush3.bf16.msra.mxu1 %v1592_v4 }
  0x19   : > { %v1598_v8 = vld [vmem:[%s1820_s8] sm:$0xff]   ;;  %1460 = vmatpush3.bf16.msra.mxu0 %v1593_v5  ;;  %1419 = vmatprep.subr.bf16.mxu1 %v1594_v6  ;;  %v1600_v14 = vld [vmem:[%s1820_s8 + $0x8] sm:$0xff]   ;;  %v1602_v16 = vld [vmem:[%s1820_s8 + $0x10] sm:$0xff]   ;;  %s283_s27 = sand.u32 1, %s1692_s19  }
  0x1a   : > { %v1599_v9 = vld [vmem:[%s1828_s14] sm:$0xff]   ;;  %1461 = vmatprep.subr.bf16.mxu0 %v1595_v7  ;;  %1423 = vmatprep.mubr.msk.bf16.mxu1 %vm500_vm0, %v1598_v8  ;;  %v1601_v15 = vld [vmem:[%s1828_s14 + $0x8] sm:$0xff]   ;;  %v1603_v17 = vld [vmem:[%s1828_s14 + $0x10] sm:$0xff]   ;;  %s1285_s9 = sshll.u32 %s283_s27, 8  ;;  %s1988_s21 = scalar_lea.sflag [#allocation3], %s283_s27 }
  0x1b   : > { %1465 = vmatprep.mubr.msk.bf16.mxu0 %vm500_vm0, %v1599_v9  ;;  %v1604_v18 = vld [vmem:[%s1820_s8 + $0x18] sm:$0xff]   ;;  %v1606_v20 = vld [vmem:[%s1820_s8 + $0x20] sm:$0xff]   ;;  %v1608_v22 = vld [vmem:[%s1820_s8 + $0x28] sm:$0xff]  }
  0x1c   : > { %1420 = vmatpush3.bf16.msra.mxu1 %v1594_v6  ;;  %v1605_v19 = vld [vmem:[%s1828_s14 + $0x18] sm:$0xff]   ;;  %v1607_v21 = vld [vmem:[%s1828_s14 + $0x20] sm:$0xff]   ;;  %v1609_v23 = vld [vmem:[%s1828_s14 + $0x28] sm:$0xff]  }
  0x1d   : > { %1462 = vmatpush3.bf16.msra.mxu0 %v1595_v7  ;;  %1529 = vmatprep.subr.msk.bf16.mxu1 %vm549_vm1, %v1596_v10  ;;  %v1610_v24 = vld [vmem:[%s1820_s8 + $0x30] sm:$0xff]   ;;  %v1612_v26 = vld [vmem:[%s1820_s8 + $0x38] sm:$0xff]   ;;  %v1614_v28 = vld [vmem:[%s1820_s8 + $0x40] sm:$0xff]  }
  0x1e   : > { %1530 = vmatprep.subr.msk.bf16.mxu0 %vm549_vm1, %v1597_v11  ;;  %v1611_v25 = vld [vmem:[%s1828_s14 + $0x30] sm:$0xff]   ;;  %v1613_v27 = vld [vmem:[%s1828_s14 + $0x38] sm:$0xff]   ;;  %v1615_v29 = vld [vmem:[%s1828_s14 + $0x40] sm:$0xff]  }
  0x1f   : > { %v1616_v30 = vld [vmem:[%s1820_s8 + $0x48] sm:$0xff]   ;;  %v1618_v32 = vld [vmem:[%s1820_s8 + $0x50] sm:$0xff]   ;;  %v1620_v34 = vld [vmem:[%s1820_s8 + $0x58] sm:$0xff]  }
  0x20   : > { %1422 = vmatpush3.bf16.msra.mxu1 %v551_v12  ;;  %v1617_v31 = vld [vmem:[%s1828_s14 + $0x48] sm:$0xff]   ;;  %v1619_v33 = vld [vmem:[%s1828_s14 + $0x50] sm:$0xff]   ;;  %v1621_v35 = vld [vmem:[%s1828_s14 + $0x58] sm:$0xff]  }
  0x21   : > { %1464 = vmatpush3.bf16.msra.mxu0 %v870_v13  ;;  %v1622_v36 = vld [vmem:[%s1820_s8 + $0x60] sm:$0xff]   ;;  %v1624_v38 = vld [vmem:[%s1820_s8 + $0x68] sm:$0xff]   ;;  %v1626_v40 = vld [vmem:[%s1820_s8 + $0x70] sm:$0xff]  }
  0x22   : > { %v1623_v37 = vld [vmem:[%s1828_s14 + $0x60] sm:$0xff]   ;;  %v1625_v39 = vld [vmem:[%s1828_s14 + $0x68] sm:$0xff]   ;;  %v1627_v41 = vld [vmem:[%s1828_s14 + $0x70] sm:$0xff]  }
  0x23   : > { %1424 = vmatmul.mubr.msk.bf16.vlgmr.msra.gmra.mrb[0].mxu1 %vm500_vm0, %v1600_v14  ;;  %v1628_v42 = vld [vmem:[%s1820_s8 + $0x78] sm:$0xff]   ;;  %s1915_s8 = scalar_lea.vmem [#allocation2], %s1285_s9 }
  0x24   : > { %1466 = vmatmul.mubr.msk.bf16.vlgmr.msra.gmra.mrb[0].mxu0 %vm500_vm0, %v1601_v15  ;;  %1427 = vmatprep.mubr.msk.bf16.mxu1 %vm500_vm0, %v1602_v16  ;;  %v1629_v43 = vld [vmem:[%s1828_s14 + $0x78] sm:$0xff]   ;;  %s1151_s12 = sshll.u32 %s1915_s8, 4  ;;  %s1981_s12 = int_to_ptr.vmem [resolvable:$true] %s1151_s12 }
  0x25   : > { %1469 = vmatprep.mubr.msk.bf16.mxu0 %vm500_vm0, %v1603_v17  ;;  %s1630_s15 = scalar_lea.vmem %s1981_s12, 4096  ;;  %p1637_p1 = scmp.lt.s32.totalorder %s1981_s12, %s1635_s17 }
  0x26   : > { %p1631_p12 = scmp.ne.s32.totalorder %s1981_s12, %s1630_s15  ;;  %p1638_p2 = scmp.lt.s32.totalorder %s1636_s24, %s1630_s15 }
  0x28   : > { %p1632_p13 = pnand %p1631_p12, %p1783_p4  ;;  %p1639_p3 = por %p1638_p2, %p1637_p1 }
  0x2a   : > { %p1633_p0 = pneg %p1632_p13 }
  0x2b   : > { %1428 = vmatmul.mubr.msk.bf16.gmra.mrb[4].mxu1 %vm500_vm0, %v1604_v18 }
  0x2c   : > { %1470 = vmatmul.mubr.msk.bf16.gmra.mrb[4].mxu0 %vm500_vm0, %v1605_v19  ;;  %1431 = vmatprep.mubr.msk.bf16.mxu1 %vm500_vm0, %v1606_v20  ;;  %p1640_p5 = pnand %p1639_p3, %p1633_p0 }
  0x2d   : > { %1473 = vmatprep.mubr.msk.bf16.mxu0 %vm500_vm0, %v1607_v21 }
  0x33   : > { %1432 = vmatmul.mubr.msk.bf16.gmra.mrb[8].mxu1 %vm500_vm0, %v1608_v22 }
  0x34   : > { %1474 = vmatmul.mubr.msk.bf16.gmra.mrb[8].mxu0 %vm500_vm0, %v1609_v23  ;;  %1435 = vmatprep.mubr.msk.bf16.mxu1 %vm500_vm0, %v1610_v24 }
  0x35   : > { %1477 = vmatprep.mubr.msk.bf16.mxu0 %vm500_vm0, %v1611_v25 }
  0x3b   : > { %1436 = vmatmul.mubr.msk.bf16.gmra.mrb[12].mxu1 %vm500_vm0, %v1612_v26 }
  0x3c   : > { %1478 = vmatmul.mubr.msk.bf16.gmra.mrb[12].mxu0 %vm500_vm0, %v1613_v27  ;;  %1439 = vmatprep.mubr.msk.bf16.mxu1 %vm500_vm0, %v1614_v28 }
  0x3d   : > { %1481 = vmatprep.mubr.msk.bf16.mxu0 %vm500_vm0, %v1615_v29 }
  0x43   : > { %1440 = vmatmul.mubr.msk.bf16.gmra.mrb[16].mxu1 %vm500_vm0, %v1616_v30 }
  0x44   : > { %1482 = vmatmul.mubr.msk.bf16.gmra.mrb[16].mxu0 %vm500_vm0, %v1617_v31  ;;  %1443 = vmatprep.mubr.msk.bf16.mxu1 %vm500_vm0, %v1618_v32 }
  0x45   : > { %1485 = vmatprep.mubr.msk.bf16.mxu0 %vm500_vm0, %v1619_v33 }
  0x4b   : > { %1444 = vmatmul.mubr.msk.bf16.gmra.mrb[20].mxu1 %vm500_vm0, %v1620_v34 }
  0x4c   : > { %1486 = vmatmul.mubr.msk.bf16.gmra.mrb[20].mxu0 %vm500_vm0, %v1621_v35  ;;  %1447 = vmatprep.mubr.msk.bf16.mxu1 %vm500_vm0, %v1622_v36 }
  0x4d   : > { %1489 = vmatprep.mubr.msk.bf16.mxu0 %vm500_vm0, %v1623_v37 }
  0x53   : > { %1448 = vmatmul.mubr.msk.bf16.gmra.mrb[24].mxu1 %vm500_vm0, %v1624_v38 }
  0x54   : > { %1490 = vmatmul.mubr.msk.bf16.gmra.mrb[24].mxu0 %vm500_vm0, %v1625_v39  ;;  %1451 = vmatprep.mubr.msk.bf16.mxu1 %vm500_vm0, %v1626_v40 }
  0x55   : > { %1493 = vmatprep.mubr.msk.bf16.mxu0 %vm500_vm0, %v1627_v41 }
  0x5b   : > { %1452 = vmatmul.mubr.msk.bf16.gmra.mrb[28].mxu1 %vm500_vm0, %v1628_v42 }
  0x5c   : > { %1494 = vmatmul.mubr.msk.bf16.gmra.mrb[28].mxu0 %vm500_vm0, %v1629_v43 }
  0xf6   : > { %v1425_v44 = vpop.f32.mrb[0].mxu1 }
  0xf7   : > { %v1467_v45 = vpop.f32.mrb[0].mxu0  ;;  %v587_v47 = vpop.f32.mrb[1].mxu1 }
  0xf8   : > { %v915_v48 = vadd.f32 %v1467_v45, %v1425_v44  ;;  %v906_v49 = vpop.f32.mrb[1].mxu0  ;;  %v1426_v50 = vpop.f32.mrb[2].mxu1 }
  0xf9   : > { %v907_v51 = vadd.f32 %v906_v49, %v587_v47  ;;  %v1468_v52 = vpop.f32.mrb[2].mxu0  ;;  %v590_v53 = vpop.f32.mrb[3].mxu1 }
  0xfa   : > { %v1042_v54 = vadd.f32 %v1907_v46, %v915_v48  ;;  %v918_v55 = vadd.f32 %v1468_v52, %v1426_v50  ;;  %v909_v56 = vpop.f32.mrb[3].mxu0 }
  0xfb   : > { %v1040_v57 = vadd.f32 %v1907_v46, %v907_v51  ;;  %v910_v58 = vadd.f32 %v909_v56, %v590_v53 }
  0xfc   : > { %v1074_v59 = vmax.f32 %v1042_v54, 0.0  ;;  %v1043_v60 = vadd.f32 %v1907_v46, %v918_v55 }
  0xfd   : > { %v1072_v61 = vmax.f32 %v1040_v57, 0.0  ;;  %v1041_v62 = vadd.f32 %v1907_v46, %v910_v58 }
  0xfe   : > { %1106 = vst [vmem:[%s1915_s8 + $0x10] sm:$0xff] %v1074_v59  ;;  %v1075_v63 = vmax.f32 %v1043_v60, 0.0  ;;  %v1429_v0 = vpop.f32.mrb[4].mxu1 }
  0xff   : > { %1104 = vst [vmem:[%s1915_s8] sm:$0xff] %v1072_v61  ;;  %v1073_v1 = vmax.f32 %v1041_v62, 0.0  ;;  %v1471_v2 = vpop.f32.mrb[4].mxu0  ;;  %v603_v3 = vpop.f32.mrb[5].mxu1 }
 0x100   : > { %1107 = vst [vmem:[%s1915_s8 + $0x18] sm:$0xff] %v1075_v63  ;;  %v931_v4 = vadd.f32 %v1471_v2, %v1429_v0  ;;  %v922_v5 = vpop.f32.mrb[5].mxu0  ;;  %v1430_v6 = vpop.f32.mrb[6].mxu1 }
 0x101   : > { %1105 = vst [vmem:[%s1915_s8 + $0x8] sm:$0xff] %v1073_v1  ;;  %v923_v7 = vadd.f32 %v922_v5, %v603_v3  ;;  %v1472_v8 = vpop.f32.mrb[6].mxu0  ;;  %v606_v9 = vpop.f32.mrb[7].mxu1 }
 0x102   : > { %v1046_v10 = vadd.f32 %v1907_v46, %v931_v4  ;;  %v934_v11 = vadd.f32 %v1472_v8, %v1430_v6  ;;  %v925_v12 = vpop.f32.mrb[7].mxu0 }
 0x103   : > { %v1044_v13 = vadd.f32 %v1907_v46, %v923_v7  ;;  %v926_v14 = vadd.f32 %v925_v12, %v606_v9 }
 0x104   : > { %v1078_v15 = vmax.f32 %v1046_v10, 0.0  ;;  %v1047_v16 = vadd.f32 %v1907_v46, %v934_v11 }
 0x105   : > { %v1076_v17 = vmax.f32 %v1044_v13, 0.0  ;;  %v1045_v18 = vadd.f32 %v1907_v46, %v926_v14 }
 0x106   : > { %1110 = vst [vmem:[%s1915_s8 + $0x30] sm:$0xff] %v1078_v15  ;;  %v1079_v19 = vmax.f32 %v1047_v16, 0.0  ;;  %v1433_v20 = vpop.f32.mrb[8].mxu1 }
 0x107   : > { %1108 = vst [vmem:[%s1915_s8 + $0x20] sm:$0xff] %v1076_v17  ;;  %v1077_v21 = vmax.f32 %v1045_v18, 0.0  ;;  %v1475_v22 = vpop.f32.mrb[8].mxu0  ;;  %v619_v23 = vpop.f32.mrb[9].mxu1 }
 0x108   : > { %1111 = vst [vmem:[%s1915_s8 + $0x38] sm:$0xff] %v1079_v19  ;;  %v947_v24 = vadd.f32 %v1475_v22, %v1433_v20  ;;  %v938_v25 = vpop.f32.mrb[9].mxu0  ;;  %v1434_v26 = vpop.f32.mrb[10].mxu1 }
 0x109   : > { %1109 = vst [vmem:[%s1915_s8 + $0x28] sm:$0xff] %v1077_v21  ;;  %v939_v27 = vadd.f32 %v938_v25, %v619_v23  ;;  %v1476_v28 = vpop.f32.mrb[10].mxu0  ;;  %v622_v29 = vpop.f32.mrb[11].mxu1 }
 0x10a   : > { %v1050_v30 = vadd.f32 %v1907_v46, %v947_v24  ;;  %v950_v31 = vadd.f32 %v1476_v28, %v1434_v26  ;;  %v941_v32 = vpop.f32.mrb[11].mxu0 }
 0x10b   : > { %v1048_v33 = vadd.f32 %v1907_v46, %v939_v27  ;;  %v942_v34 = vadd.f32 %v941_v32, %v622_v29 }
 0x10c   : > { %v1082_v35 = vmax.f32 %v1050_v30, 0.0  ;;  %v1051_v36 = vadd.f32 %v1907_v46, %v950_v31 }
 0x10d   : > { %v1080_v37 = vmax.f32 %v1048_v33, 0.0  ;;  %v1049_v38 = vadd.f32 %v1907_v46, %v942_v34 }
 0x10e   : > { %1114 = vst [vmem:[%s1915_s8 + $0x50] sm:$0xff] %v1082_v35  ;;  %v1083_v39 = vmax.f32 %v1051_v36, 0.0  ;;  %v1437_v40 = vpop.f32.mrb[12].mxu1 }
 0x10f   : > { %1112 = vst [vmem:[%s1915_s8 + $0x40] sm:$0xff] %v1080_v37  ;;  %v1081_v41 = vmax.f32 %v1049_v38, 0.0  ;;  %v1479_v42 = vpop.f32.mrb[12].mxu0  ;;  %v635_v43 = vpop.f32.mrb[13].mxu1 }
 0x110   : > { %1115 = vst [vmem:[%s1915_s8 + $0x58] sm:$0xff] %v1083_v39  ;;  %v963_v44 = vadd.f32 %v1479_v42, %v1437_v40  ;;  %v954_v45 = vpop.f32.mrb[13].mxu0  ;;  %v1438_v47 = vpop.f32.mrb[14].mxu1 }
 0x111   : > { %1113 = vst [vmem:[%s1915_s8 + $0x48] sm:$0xff] %v1081_v41  ;;  %v955_v48 = vadd.f32 %v954_v45, %v635_v43  ;;  %v1480_v49 = vpop.f32.mrb[14].mxu0  ;;  %v638_v50 = vpop.f32.mrb[15].mxu1 }
 0x112   : > { %v1054_v51 = vadd.f32 %v1907_v46, %v963_v44  ;;  %v966_v52 = vadd.f32 %v1480_v49, %v1438_v47  ;;  %v957_v53 = vpop.f32.mrb[15].mxu0 }
 0x113   : > { %v1052_v54 = vadd.f32 %v1907_v46, %v955_v48  ;;  %v958_v55 = vadd.f32 %v957_v53, %v638_v50 }
 0x114   : > { %v1086_v56 = vmax.f32 %v1054_v51, 0.0  ;;  %v1055_v57 = vadd.f32 %v1907_v46, %v966_v52 }
 0x115   : > { %v1084_v58 = vmax.f32 %v1052_v54, 0.0  ;;  %v1053_v59 = vadd.f32 %v1907_v46, %v958_v55 }
 0x116   : > { %1118 = vst [vmem:[%s1915_s8 + $0x70] sm:$0xff] %v1086_v56  ;;  %v1087_v60 = vmax.f32 %v1055_v57, 0.0  ;;  %v1441_v61 = vpop.f32.mrb[16].mxu1 }
 0x117   : > { %1116 = vst [vmem:[%s1915_s8 + $0x60] sm:$0xff] %v1084_v58  ;;  %v1085_v62 = vmax.f32 %v1053_v59, 0.0  ;;  %v1483_v63 = vpop.f32.mrb[16].mxu0  ;;  %v651_v0 = vpop.f32.mrb[17].mxu1 }
 0x118   : > { %1119 = vst [vmem:[%s1915_s8 + $0x78] sm:$0xff] %v1087_v60  ;;  %v979_v1 = vadd.f32 %v1483_v63, %v1441_v61  ;;  %v970_v2 = vpop.f32.mrb[17].mxu0  ;;  %v1442_v3 = vpop.f32.mrb[18].mxu1 }
 0x119   : > { %1117 = vst [vmem:[%s1915_s8 + $0x68] sm:$0xff] %v1085_v62  ;;  %v971_v4 = vadd.f32 %v970_v2, %v651_v0  ;;  %v1484_v5 = vpop.f32.mrb[18].mxu0  ;;  %v654_v6 = vpop.f32.mrb[19].mxu1 }
 0x11a   : > { %v1058_v7 = vadd.f32 %v1907_v46, %v979_v1  ;;  %v982_v8 = vadd.f32 %v1484_v5, %v1442_v3  ;;  %v973_v9 = vpop.f32.mrb[19].mxu0 }
 0x11b   : > { %v1056_v10 = vadd.f32 %v1907_v46, %v971_v4  ;;  %v974_v11 = vadd.f32 %v973_v9, %v654_v6 }
 0x11c   : > { %v1090_v12 = vmax.f32 %v1058_v7, 0.0  ;;  %v1059_v13 = vadd.f32 %v1907_v46, %v982_v8 }
 0x11d   : > { %v1088_v14 = vmax.f32 %v1056_v10, 0.0  ;;  %v1057_v15 = vadd.f32 %v1907_v46, %v974_v11 }
 0x11e   : > { %1122 = vst [vmem:[%s1915_s8 + $0x90] sm:$0xff] %v1090_v12  ;;  %v1091_v16 = vmax.f32 %v1059_v13, 0.0  ;;  %v1445_v17 = vpop.f32.mrb[20].mxu1 }
 0x11f   : > { %1120 = vst [vmem:[%s1915_s8 + $0x80] sm:$0xff] %v1088_v14  ;;  %v1089_v18 = vmax.f32 %v1057_v15, 0.0  ;;  %v1487_v19 = vpop.f32.mrb[20].mxu0  ;;  %v667_v20 = vpop.f32.mrb[21].mxu1 }
 0x120   : > { %1123 = vst [vmem:[%s1915_s8 + $0x98] sm:$0xff] %v1091_v16  ;;  %v995_v21 = vadd.f32 %v1487_v19, %v1445_v17  ;;  %v986_v22 = vpop.f32.mrb[21].mxu0  ;;  %v1446_v23 = vpop.f32.mrb[22].mxu1 }
 0x121   : > { %1121 = vst [vmem:[%s1915_s8 + $0x88] sm:$0xff] %v1089_v18  ;;  %v987_v24 = vadd.f32 %v986_v22, %v667_v20  ;;  %v1488_v25 = vpop.f32.mrb[22].mxu0  ;;  %v670_v26 = vpop.f32.mrb[23].mxu1 }
 0x122   : > { %v1062_v27 = vadd.f32 %v1907_v46, %v995_v21  ;;  %v998_v28 = vadd.f32 %v1488_v25, %v1446_v23  ;;  %v989_v29 = vpop.f32.mrb[23].mxu0 }
 0x123   : > { %v1060_v30 = vadd.f32 %v1907_v46, %v987_v24  ;;  %v990_v31 = vadd.f32 %v989_v29, %v670_v26 }
 0x124   : > { %v1094_v32 = vmax.f32 %v1062_v27, 0.0  ;;  %v1063_v33 = vadd.f32 %v1907_v46, %v998_v28 }
 0x125   : > { %v1092_v34 = vmax.f32 %v1060_v30, 0.0  ;;  %v1061_v35 = vadd.f32 %v1907_v46, %v990_v31 }
 0x126   : > { %1126 = vst [vmem:[%s1915_s8 + $0xb0] sm:$0xff] %v1094_v32  ;;  %v1095_v36 = vmax.f32 %v1063_v33, 0.0  ;;  %v1449_v37 = vpop.f32.mrb[24].mxu1 }
 0x127   : > { %1124 = vst [vmem:[%s1915_s8 + $0xa0] sm:$0xff] %v1092_v34  ;;  %v1093_v38 = vmax.f32 %v1061_v35, 0.0  ;;  %v1491_v39 = vpop.f32.mrb[24].mxu0  ;;  %v683_v40 = vpop.f32.mrb[25].mxu1 }
 0x128   : > { %1127 = vst [vmem:[%s1915_s8 + $0xb8] sm:$0xff] %v1095_v36  ;;  %v1011_v41 = vadd.f32 %v1491_v39, %v1449_v37  ;;  %v1002_v42 = vpop.f32.mrb[25].mxu0  ;;  %v1450_v43 = vpop.f32.mrb[26].mxu1 }
 0x129   : > { %1125 = vst [vmem:[%s1915_s8 + $0xa8] sm:$0xff] %v1093_v38  ;;  %v1003_v44 = vadd.f32 %v1002_v42, %v683_v40  ;;  %v1492_v45 = vpop.f32.mrb[26].mxu0  ;;  %v686_v47 = vpop.f32.mrb[27].mxu1 }
 0x12a   : > { %v1066_v48 = vadd.f32 %v1907_v46, %v1011_v41  ;;  %v1014_v49 = vadd.f32 %v1492_v45, %v1450_v43  ;;  %v1005_v50 = vpop.f32.mrb[27].mxu0 }
 0x12b   : > { %v1064_v51 = vadd.f32 %v1907_v46, %v1003_v44  ;;  %v1006_v52 = vadd.f32 %v1005_v50, %v686_v47 }
 0x12c   : > { %v1098_v53 = vmax.f32 %v1066_v48, 0.0  ;;  %v1067_v54 = vadd.f32 %v1907_v46, %v1014_v49 }
 0x12d   : > { %v1096_v55 = vmax.f32 %v1064_v51, 0.0  ;;  %v1065_v56 = vadd.f32 %v1907_v46, %v1006_v52 }
 0x12e   : > { %1130 = vst [vmem:[%s1915_s8 + $0xd0] sm:$0xff] %v1098_v53  ;;  %v1099_v57 = vmax.f32 %v1067_v54, 0.0  ;;  %v1453_v58 = vpop.f32.mrb[28].mxu1 }
 0x12f   : > { %1128 = vst [vmem:[%s1915_s8 + $0xc0] sm:$0xff] %v1096_v55  ;;  %v1097_v59 = vmax.f32 %v1065_v56, 0.0  ;;  %v1495_v60 = vpop.f32.mrb[28].mxu0  ;;  %v699_v61 = vpop.f32.mrb[29].mxu1 }
 0x130   : > { %1131 = vst [vmem:[%s1915_s8 + $0xd8] sm:$0xff] %v1099_v57  ;;  %v1027_v62 = vadd.f32 %v1495_v60, %v1453_v58  ;;  %v1018_v63 = vpop.f32.mrb[29].mxu0  ;;  %v1454_v0 = vpop.f32.mrb[30].mxu1 }
 0x131   : > { %1129 = vst [vmem:[%s1915_s8 + $0xc8] sm:$0xff] %v1097_v59  ;;  %v1019_v1 = vadd.f32 %v1018_v63, %v699_v61  ;;  %v1496_v2 = vpop.f32.mrb[30].mxu0  ;;  %v702_v3 = vpop.f32.mrb[31].mxu1 }
 0x132   : > { %v1070_v4 = vadd.f32 %v1907_v46, %v1027_v62  ;;  %v1030_v5 = vadd.f32 %v1496_v2, %v1454_v0  ;;  %v1021_v6 = vpop.f32.mrb[31].mxu0 }
 0x133   : > { %v1068_v7 = vadd.f32 %v1907_v46, %v1019_v1  ;;  %v1022_v8 = vadd.f32 %v1021_v6, %v702_v3 }
 0x134   : > { %v1102_v9 = vmax.f32 %v1070_v4, 0.0  ;;  %v1071_v10 = vadd.f32 %v1907_v46, %v1030_v5 }
 0x135   : > { %v1100_v11 = vmax.f32 %v1068_v7, 0.0  ;;  %v1069_v12 = vadd.f32 %v1907_v46, %v1022_v8 }
 0x136   : > { %1134 = vst [vmem:[%s1915_s8 + $0xf0] sm:$0xff] %v1102_v9  ;;  %v1103_v13 = vmax.f32 %v1071_v10, 0.0 }
 0x137   : > { %1132 = vst [vmem:[%s1915_s8 + $0xe0] sm:$0xff] %v1100_v11  ;;  %v1101_v14 = vmax.f32 %v1069_v12, 0.0 }
 0x138   : > { %1135 = vst [vmem:[%s1915_s8 + $0xf8] sm:$0xff] %v1103_v13 }
 0x139   : > { %1133 = vst [vmem:[%s1915_s8 + $0xe8] sm:$0xff] %v1101_v14 }
 0x13a   : > { %1643 = shalt.err (!%p1640_p5)
}
 0x13b   : > { %s1644_s25 = scalar_lea.hbm %s1979_s11, 4096  ;;  %s1648_s7 = scalar_lea.hbm %s2039_s5, 8192 }
 0x13c   : > { %p1645_p6 = scmp.ne.s32.totalorder %s1979_s11, %s1644_s25  ;;  %p1649_p10 = scmp.lt.u32.totalorder %s1979_s11, %s2039_s5 }
 0x13d   : > { %p1650_p11 = scmp.lt.u32.totalorder %s1648_s7, %s1644_s25  ;;  %p1652_p13 = scmp.lt.u32.totalorder %s1644_s25, %s1979_s11 }
 0x13e   : > { %p1646_p7 = pnand %p1645_p6, %p1783_p4 }
 0x13f   : > { %p1651_p12 = por %p1650_p11, %p1649_p10 }
 0x140   : > { %p1647_p9 = pneg %p1646_p7 }
 0x141   : > { %p1653_p0 = por %p1652_p13, %p1651_p12 }
 0x143   : > { %p1654_p1 = pnand %p1653_p0, %p1647_p9 }
 0x145   : > { %1657 = shalt.err (!%p1654_p1)
}
 0x146   : > { %s1711_s10 = smov 128   ;;  %s1712_s13 = smov 8  }
 0x147   : > { %1531 = dma.vmem_to_hbm [thread:$0]  (%p1783_p4), %s1981_s12, 4096, %s1979_s11, %s1988_s21, %s1711_s10, %s1711_s10, %s1712_s13  }
 0x148 PF: > { %p1537_p2 = scmp.ge.s32.totalorder %s1708_s23, 2  ;;  %s1166_s14 = sand.u32 1, %s1688_s18  }
 0x149   : > { %s1167_s15 = scalar_lea.sflag [#allocation3], %s1166_s14 }
 0x14a   : > { %p1534_p3 = pnand %p1537_p2, %p1790_p8 }
 0x14c   : > { %1683 = dma.done.wait (!%p1534_p3), %s1167_s15, 4096  }
 0x14d   : > { %1685 = vsyncadd (!%p1534_p3), %s1167_s15, 4294963200  ;;  %s18_s23 = sadd.s32 1, %s1708_s23   ;;  %s2042_s18 = smov %s1692_s19 }
 0x14e   : > { %p15_p5 = scmp.ge.s32.totalorder %s18_s23, 4   ;;  %s2043_s19 = smov %s1696_s20 }
 0x14f   : > { %s2044_s20 = smov %s1796_s6  ;;  %s2045_s21 = smov %s1704_s22 }
 0x150   : > { %s2046_s22 = smov %s2048_s26  ;;  %17 = sbr.rel (!%p15_p5) target bundleno = 4 (0x4), region = 87 }
 0x157   :  { %1172 = vsyncpa [#allocation3], 1 }
 0x158   :  { %1174 = vsyncpa [#allocation3 + $0x1], 1 }

</bundles_post_ra>
